<compile_context>
chip_gen: v7x
topology: tpu7x:2x2x1
jax: 0.10.0
libtpu: 0.0.40
codegen_flags: <defaults>
</compile_context>

<pallas_src>
from functools import partial

import jax
import jax.numpy as jnp
from jax.experimental import pallas as pl
from jax.experimental.pallas import tpu as pltpu


# ----------------------------------------------------------------------------
# Pallas kernel: one batch tile of the whole forward pass.
# x tile arrives batch-major [TB, IN]; all compute is lane-major (batch on the
# lane axis): h [H, TB], out [A, TB].
# ----------------------------------------------------------------------------
def _fcdp_kernel(x_ref, w1_ref, w2_ref, w3_ref, c_ref, o_ref, *, h0, h1, a):
    c = c_ref[...]                       # [Hmax, 5] packed columns
    b1 = c[:h0, 0:1]                     # [H0, 1]
    b2 = c[:h1, 1:2]                     # [H1, 1]
    b3 = c[:a, 2:3]                      # [A, 1]
    scale = c[:a, 3:4]                   # [A, 1]
    offset = c[:a, 4:5]                  # [A, 1]

    # input layer + ReLU:  h = W1 @ x^T + b1   (transpose folds into the MXU op)
    h = jnp.dot(w1_ref[...], x_ref[...].T,
                preferred_element_type=jnp.float32) + b1
    h = jnp.maximum(h, 0.0)              # [H0, TB]

    # hidden layer + ReLU (hidden_dims=(32, 32) -> exactly one hidden layer)
    h = jnp.dot(w2_ref[...], h, preferred_element_type=jnp.float32) + b2
    h = jnp.maximum(h, 0.0)              # [H1, TB]

    # output layer + tanh
    y = jnp.tanh(jnp.dot(w3_ref[...], h, preferred_element_type=jnp.float32) + b3)

    # rescale_fn with nn_min=-1, nn_max=+1 folded into: out = y*scale + offset
    o_ref[...] = y * scale + offset      # [A, TB] lane-dense store


@partial(jax.jit, static_argnames=("max_tb",))
def fcdp_forward(x, params, env_min, env_max, *, max_tb=1024):
    """x: [B, input_dim] float32 -> [B, action_dim] float32."""
    w1, b1, w2, b2, w3, b3 = params
    B, IN = x.shape
    H0, H1, A = w1.shape[0], w2.shape[0], w3.shape[0]

    # Rescale constants: out = (tanh + 1) * (env_max - env_min)/2 + env_min
    env_min_v = jnp.asarray(env_min, jnp.float32).reshape(-1)
    env_max_v = jnp.asarray(env_max, jnp.float32).reshape(-1)
    scale = (env_max_v - env_min_v) * 0.5
    offset = env_min_v + scale

    # Pack all [n,1] constants into one [Hmax, 5] array (fewer operands).
    Hmax = max(H0, H1, A)
    def col(v):
        v = jnp.asarray(v, jnp.float32).reshape(-1, 1)
        return jnp.pad(v, ((0, Hmax - v.shape[0]), (0, 0)))
    consts = jnp.concatenate(
        [col(b1), col(b2), col(b3), col(scale), col(offset)], axis=1)  # [Hmax,5]

    # Batch tiling: single block for small batches, 1024-lane tiles otherwise.
    if B <= max_tb:
        tb, nb = B, 1
    else:
        tb, nb = max_tb, pl.cdiv(B, max_tb)   # ragged last block: masked writeback

    kernel = partial(_fcdp_kernel, h0=H0, h1=H1, a=A)
    const_spec = lambda shape: pl.BlockSpec(shape, lambda i: (0, 0))

    out_t = pl.pallas_call(
        kernel,
        out_shape=jax.ShapeDtypeStruct((A, B), jnp.float32),
        grid=(nb,),
        in_specs=[
            pl.BlockSpec((tb, IN), lambda i: (i, 0)),   # x tile (contiguous DMA)
            const_spec((H0, IN)),                       # W1 (VMEM-resident)
            const_spec((H1, H0)),                       # W2
            const_spec((A, H1)),                        # W3
            const_spec((Hmax, 5)),                      # packed b1|b2|b3|scale|offset
        ],
        out_specs=pl.BlockSpec((A, tb), lambda i: (0, i)),
        compiler_params=pltpu.CompilerParams(
            dimension_semantics=("parallel",)),         # v7x: shard batch over 2 TCs
    )(x, w1, w2, w3, consts)

    return out_t.T                                      # [B, A] (tiny, fused in jit)


# ----------------------------------------------------------------------------
# Deterministic parameter init (mirrors layer_init: orthogonal * gain, bias=0).
# Weights kept in PyTorch layout [out_features, in_features].
# ----------------------------------------------------------------------------
def orthogonal(key, out_f, in_f, gain):
    rows, cols = out_f, in_f
    n, m = (rows, cols) if rows >= cols else (cols, rows)
    a = jax.random.normal(key, (n, m), jnp.float32)
    q, r = jnp.linalg.qr(a)
    d = jnp.diagonal(r)
    q = q * jnp.where(d == 0, 1.0, jnp.sign(d))
    if rows < cols:
        q = q.T
    return gain * q[:rows, :cols]


def init_fcdp_params(key, input_dim, hidden_dims, action_dim):
    relu_gain = jnp.sqrt(2.0)   # nn.init.calculate_gain('relu')
    tanh_gain = 5.0 / 3.0       # nn.init.calculate_gain('tanh')
    k1, k2, k3 = jax.random.split(key, 3)
    w1 = orthogonal(k1, hidden_dims[0], input_dim, relu_gain)        # [H0, IN]
    b1 = jnp.zeros((hidden_dims[0], 1), jnp.float32)
    w2 = orthogonal(k2, hidden_dims[1], hidden_dims[0], relu_gain)   # [H1, H0]
    b2 = jnp.zeros((hidden_dims[1], 1), jnp.float32)
    w3 = orthogonal(k3, action_dim, hidden_dims[1], tanh_gain)       # [A, H1]
    b3 = jnp.zeros((action_dim, 1), jnp.float32)
    return (w1, b1, w2, b2, w3, b3)


# ----------------------------------------------------------------------------
# Pure-JAX reference (batch-major, matches nn.Linear: x @ W.T + b)
# ----------------------------------------------------------------------------
def fcdp_reference(x, params, env_min, env_max):
    w1, b1, w2, b2, w3, b3 = params
    h = jnp.maximum(x @ w1.T + b1.reshape(1, -1), 0.0)
    h = jnp.maximum(h @ w2.T + b2.reshape(1, -1), 0.0)
    y = jnp.tanh(h @ w3.T + b3.reshape(1, -1))
    env_min = jnp.asarray(env_min, jnp.float32).reshape(1, -1)
    env_max = jnp.asarray(env_max, jnp.float32).reshape(1, -1)
    return (y + 1.0) * (env_max - env_min) * 0.5 + env_min


if __name__ == "__main__":
    input_dim = 8
    hidden_dims = (32, 32)
    action_dim = 4

    key = jax.random.PRNGKey(0)
    k_param, k_small, k_big = jax.random.split(key, 3)

    params = init_fcdp_params(k_param, input_dim, hidden_dims, action_dim)

    # action_bounds = (env_min, env_max)
    env_min = jnp.array([-2.0, -1.0, -0.5, -3.0], jnp.float32)
    env_max = jnp.array([2.0, 1.0, 0.5, 3.0], jnp.float32)

    # Small-batch case (acting path): single block covering the whole batch.
    x_small = jax.random.normal(k_small, (2, input_dim), jnp.float32)
    out_small = jax.block_until_ready(fcdp_forward(x_small, params, env_min, env_max))
    ref_small = fcdp_reference(x_small, params, env_min, env_max)
    assert out_small.shape == (2, action_dim)
    assert jnp.allclose(out_small, ref_small, atol=1e-5, rtol=1e-5)

    # Larger batch: exercises the 1024-lane tiling with a ragged final block
    # (masked writeback, no explicit padding).
    x_big = jax.random.normal(k_big, (1300, input_dim), jnp.float32)
    out_big = jax.block_until_ready(fcdp_forward(x_big, params, env_min, env_max))
    ref_big = fcdp_reference(x_big, params, env_min, env_max)
    assert out_big.shape == (1300, action_dim)
    assert jnp.allclose(out_big, ref_big, atol=1e-5, rtol=1e-5)

    print("KERNEL_OK")
</pallas_src>

<mosaic_0001>
module attributes {stable_mosaic.version = 11 : i64} {
  func.func @_fcdp_kernel(%arg0: i32, %arg1: memref<2x8xf32, #tpu.memory_space<vmem>>, %arg2: memref<32x8xf32, #tpu.memory_space<vmem>>, %arg3: memref<32x32xf32, #tpu.memory_space<vmem>>, %arg4: memref<4x32xf32, #tpu.memory_space<vmem>>, %arg5: memref<32x5xf32, #tpu.memory_space<vmem>>, %arg6: memref<4x2xf32, #tpu.memory_space<vmem>>) attributes {dimension_semantics = [#tpu.dimension_semantics<parallel>], iteration_bounds = array<i64: 1>, scalar_prefetch = 0 : i64, scratch_operands = 0 : i64, tpu.core_type = #tpu.core_type<tc>, window_params = [{transform_indices = @transform_0, window_bounds = array<i64: 2, 8>}, {pipeline_mode = #tpu.pipeline_mode<synchronous>, transform_indices = @transform_1, window_bounds = array<i64: 32, 8>}, {pipeline_mode = #tpu.pipeline_mode<synchronous>, transform_indices = @transform_2, window_bounds = array<i64: 32, 32>}, {pipeline_mode = #tpu.pipeline_mode<synchronous>, transform_indices = @transform_3, window_bounds = array<i64: 4, 32>}, {pipeline_mode = #tpu.pipeline_mode<synchronous>, transform_indices = @transform_4, window_bounds = array<i64: 32, 5>}, {transform_indices = @transform_5, window_bounds = array<i64: 4, 2>}]} {
    %c0 = arith.constant 0 : index
    %c0_0 = arith.constant 0 : index
    %0 = vector.load %arg5[%c0, %c0_0] : memref<32x5xf32, #tpu.memory_space<vmem>>, vector<32x5xf32>
    %1 = vector.extract_strided_slice %0 {offsets = [0, 0], sizes = [32, 1], strides = [1, 1]} : vector<32x5xf32> to vector<32x1xf32>
    %2 = vector.extract_strided_slice %0 {offsets = [0, 1], sizes = [32, 1], strides = [1, 1]} : vector<32x5xf32> to vector<32x1xf32>
    %3 = vector.extract_strided_slice %0 {offsets = [0, 2], sizes = [4, 1], strides = [1, 1]} : vector<32x5xf32> to vector<4x1xf32>
    %4 = vector.extract_strided_slice %0 {offsets = [0, 3], sizes = [4, 1], strides = [1, 1]} : vector<32x5xf32> to vector<4x1xf32>
    %5 = vector.extract_strided_slice %0 {offsets = [0, 4], sizes = [4, 1], strides = [1, 1]} : vector<32x5xf32> to vector<4x1xf32>
    %c0_1 = arith.constant 0 : index
    %c0_2 = arith.constant 0 : index
    %6 = vector.load %arg2[%c0_1, %c0_2] : memref<32x8xf32, #tpu.memory_space<vmem>>, vector<32x8xf32>
    %c0_3 = arith.constant 0 : index
    %c0_4 = arith.constant 0 : index
    %7 = vector.load %arg1[%c0_3, %c0_4] : memref<2x8xf32, #tpu.memory_space<vmem>>, vector<2x8xf32>
    %8 = tpu.transpose %7, [1, 0] : vector<2x8xf32> -> vector<8x2xf32>
    %cst = arith.constant dense<0.000000e+00> : vector<32x2xf32>
    %9 = tpu.matmul %6, %8, %cst {dimension_numbers = #tpu.dot_dimension_numbers<[1], [0], [0], [1], [0, 0, 1, 1], [], []>} : vector<32x8xf32>, vector<8x2xf32>, vector<32x2xf32> -> vector<32x2xf32>
    %10 = vector.broadcast %1 : vector<32x1xf32> to vector<32x2xf32>
    %11 = arith.addf %9, %10 : vector<32x2xf32>
    %cst_5 = arith.constant 0.000000e+00 : f32
    %12 = vector.broadcast %cst_5 : f32 to vector<32x2xf32>
    %13 = arith.maximumf %11, %12 : vector<32x2xf32>
    %c0_6 = arith.constant 0 : index
    %c0_7 = arith.constant 0 : index
    %14 = vector.load %arg3[%c0_6, %c0_7] : memref<32x32xf32, #tpu.memory_space<vmem>>, vector<32x32xf32>
    %cst_8 = arith.constant dense<0.000000e+00> : vector<32x2xf32>
    %15 = tpu.matmul %14, %13, %cst_8 {dimension_numbers = #tpu.dot_dimension_numbers<[1], [0], [0], [1], [0, 0, 1, 1], [], []>} : vector<32x32xf32>, vector<32x2xf32>, vector<32x2xf32> -> vector<32x2xf32>
    %16 = vector.broadcast %2 : vector<32x1xf32> to vector<32x2xf32>
    %17 = arith.addf %15, %16 : vector<32x2xf32>
    %cst_9 = arith.constant 0.000000e+00 : f32
    %18 = vector.broadcast %cst_9 : f32 to vector<32x2xf32>
    %19 = arith.maximumf %17, %18 : vector<32x2xf32>
    %c0_10 = arith.constant 0 : index
    %c0_11 = arith.constant 0 : index
    %20 = vector.load %arg4[%c0_10, %c0_11] : memref<4x32xf32, #tpu.memory_space<vmem>>, vector<4x32xf32>
    %cst_12 = arith.constant dense<0.000000e+00> : vector<4x2xf32>
    %21 = tpu.matmul %20, %19, %cst_12 {dimension_numbers = #tpu.dot_dimension_numbers<[1], [0], [0], [1], [0, 0, 1, 1], [], []>} : vector<4x32xf32>, vector<32x2xf32>, vector<4x2xf32> -> vector<4x2xf32>
    %22 = vector.broadcast %3 : vector<4x1xf32> to vector<4x2xf32>
    %23 = arith.addf %21, %22 : vector<4x2xf32>
    %24 = math.tanh %23 : vector<4x2xf32>
    %25 = vector.broadcast %4 : vector<4x1xf32> to vector<4x2xf32>
    %26 = arith.mulf %24, %25 : vector<4x2xf32>
    %27 = vector.broadcast %5 : vector<4x1xf32> to vector<4x2xf32>
    %28 = arith.addf %26, %27 : vector<4x2xf32>
    %c0_13 = arith.constant 0 : index
    %c0_14 = arith.constant 0 : index
    %29 = vector.load %arg6[%c0_13, %c0_14] : memref<4x2xf32, #tpu.memory_space<vmem>>, vector<4x2xf32>
    tpu.vector_store %arg6[%c0_13, %c0_14], %28 {strides = array<i32>} : memref<4x2xf32, #tpu.memory_space<vmem>>, vector<4x2xf32>,
    return
  }
  func.func @transform_0(%arg0: i32) -> (i32, i32) {
    %c0_i32 = arith.constant 0 : i32
    %c0_i32_0 = arith.constant 0 : i32
    return %arg0, %c0_i32 : i32, i32
  }
  func.func @transform_1(%arg0: i32) -> (i32, i32) {
    %c0_i32 = arith.constant 0 : i32
    %c0_i32_0 = arith.constant 0 : i32
    %c0_i32_1 = arith.constant 0 : i32
    return %c0_i32, %c0_i32_0 : i32, i32
  }
  func.func @transform_2(%arg0: i32) -> (i32, i32) {
    %c0_i32 = arith.constant 0 : i32
    %c0_i32_0 = arith.constant 0 : i32
    %c0_i32_1 = arith.constant 0 : i32
    return %c0_i32, %c0_i32_0 : i32, i32
  }
  func.func @transform_3(%arg0: i32) -> (i32, i32) {
    %c0_i32 = arith.constant 0 : i32
    %c0_i32_0 = arith.constant 0 : i32
    %c0_i32_1 = arith.constant 0 : i32
    return %c0_i32, %c0_i32_0 : i32, i32
  }
  func.func @transform_4(%arg0: i32) -> (i32, i32) {
    %c0_i32 = arith.constant 0 : i32
    %c0_i32_0 = arith.constant 0 : i32
    %c0_i32_1 = arith.constant 0 : i32
    return %c0_i32, %c0_i32_0 : i32, i32
  }
  func.func @transform_5(%arg0: i32) -> (i32, i32) {
    %c0_i32 = arith.constant 0 : i32
    %c0_i32_0 = arith.constant 0 : i32
    return %c0_i32, %arg0 : i32, i32
  }
}

</mosaic_0001>

<bundles_post_ra>
// kernel: fcdp_forward.1
= control target key start
LH: loop header
LB: loop body
LE: loop exit
PB: predicated region body
PF: predicated region fallthrough
CT: control target
= control target key end

     0   :  { %vm49_vm0 = vcmask 64512   ;;  %v464_v2 = vmov 0   ;;  %vm174_vm1 = vcmask 261120   ;;  %v465_v11 = vmov 1   ;;  %s565_s0 = inlined_call_operand.vmem [shape: f32[2,8], index: 0, kind: input, shape index: {}]   ;;  %s566_s1 = inlined_call_operand.vmem [shape: f32[32,8], index: 1, kind: input, shape index: {}]   ;;  %s567_s4 = inlined_call_operand.vmem [shape: f32[32,5], index: 4, kind: input, shape index: {}]   ;;  %s568_s2 = inlined_call_operand.vmem [shape: f32[32,32], index: 2, kind: input, shape index: {}]   ;;  %s569_s3 = inlined_call_operand.vmem [shape: f32[4,32], index: 3, kind: input, shape index: {}]   ;;  %s570_s5 = inlined_call_operand.vmem [shape: f32[4,2], index: 5, kind: output, shape index: {}]  }
   0x1   :  { %v28_v0 = vld [vmem:[%s565_s0] sm:$0x3]  ;;  %454 = vset.pattern.permute.xlu0 %v464_v2  ;;  %455 = vset.pattern.permute.xlu1 %v464_v2  ;;  %v25_v4 = vld [vmem:[%s566_s1 + $0x8] sm:$0xff]  ;;  %v22_v5 = vld [vmem:[%s567_s4 + $0x10] sm:$0xff]  ;;  %v466_v33 = vmov 0.0|0.0   ;;  %vm467_vm2 = vmmov 0  }
   0x2   :  { %v24_v1 = vld [vmem:[%s566_s1] sm:$0xff]  ;;  %399 = vmatprep.subr.msk.mxu0 %vm49_vm0, %v28_v0  ;;  %v26_v6 = vld [vmem:[%s566_s1 + $0x10] sm:$0xff]  ;;  %41 = vperm.xlu1 %455, %v22_v5   ;;  %v21_v7 = vld [vmem:[%s567_s4 + $0x8] sm:$0xff]  ;;  %v468_v34 = vmov 0.0   ;;  %v469_v35 = vmov 2   ;;  %v470_v36 = vmov 3  }
   0x3   :  { %401 = vmatprep.mubr.msk.f32.mxu0 %vm49_vm0, %v24_v1  ;;  %v513_v3 = vld [vmem:[%s567_s4] sm:$0xff]  ;;  %400 = vmatpush3.xpose.msk.msra.mxu0 %vm49_vm0, %v28_v0  ;;  %v23_v8 = vld [vmem:[%s567_s4 + $0x18] sm:$0xff]  ;;  %v155_v30 = vld [vmem:[%s568_s2 + $0x8] sm:$0xff]  ;;  %v471_v37 = vmov 4   ;;  %vm365_vm3 = vcmask 11264  }
   0x4   :  { %31 = vperm.xlu0 %454, %v513_v3   ;;  %v27_v9 = vld [vmem:[%s566_s1 + $0x18] sm:$0xff]  ;;  %v154_v10 = vld [vmem:[%s568_s2] sm:$0xff]  ;;  %v156_v31 = vld [vmem:[%s568_s2 + $0x10] sm:$0xff]  ;;  %440 = vmatprep.subr.bf16.mxu0 %v466_v33 }
   0x5   :  { %415 = vmatprep.mubr.msk.f32.mxu1 %vm174_vm1, %v154_v10  ;;  %v157_v32 = vld [vmem:[%s568_s2 + $0x18] sm:$0xff]  ;;  %v276_v56 = vld [vmem:[%s569_s3] sm:$0xf] }
   0x6   :  { %402 = vmatmul.mubr.msk.f32.vlgmr.msra.gmra.mrb[0].mxu0 %vm49_vm0, %v25_v4  ;;  %46 = vperm.xlu1 %455, %v23_v8  }
   0x7   :  { %404 = vmatprep.mubr.msk.f32.mxu0 %vm49_vm0, %v26_v6 }
   0x8   :  { %36 = vperm.xlu0 %454, %v21_v7  }
   0xa   :  { %405 = vmatmul.mubr.msk.f32.gmra.mrb[2].mxu0 %vm49_vm0, %v27_v9  ;;  %457 = vset.pattern.permute.xlu1 %v465_v11 }
   0xb   :  { %163 = vperm.xlu1 %457, %v21_v7   ;;  %429 = vmatprep.mubr.msk.f32.mxu0 %vm467_vm2, %v468_v34 }
   0xc   :  { %456 = vset.pattern.permute.xlu0 %v465_v11 }
   0xd   :  { %159 = vperm.xlu0 %456, %v513_v3  }
   0xf   :  { %167 = vperm.xlu1 %457, %v22_v5  }
  0x11   :  { %171 = vperm.xlu0 %456, %v23_v8  }
  0x13   :  { %458 = vset.pattern.permute.xlu1 %v469_v35 }
  0x14   :  { %278 = vperm.xlu1 %458, %v513_v3  }
  0x15   :  { %459 = vset.pattern.permute.xlu0 %v470_v36 }
  0x16   :  { %356 = vperm.xlu0 %459, %v513_v3  }
  0x18   :  { %460 = vset.pattern.permute.xlu1 %v471_v37 }
  0x19   :  { %361 = vperm.xlu1 %460, %v513_v3  }
  0x1a   :  { %461 = vset.pattern.permute.xlu0 %v471_v37 }
  0x81   :  { %v42_v13 = vpop.permute.xlu1 %41 }
  0x83   :  { %v32_v12 = vpop.permute.xlu0 %31 }
  0x85   :  { %v47_v20 = vpop.permute.xlu1 %46 }
  0x87   :  { %v37_v14 = vpop.permute.xlu0 %36 }
  0x8a   :  { %v164_v39 = vpop.permute.xlu1 %163 }
  0x8c   :  { %v160_v38 = vpop.permute.xlu0 %159 }
  0x8e   :  { %v168_v48 = vpop.permute.xlu1 %167 }
  0x90   :  { %v172_v45 = vpop.permute.xlu0 %171 }
  0x93   :  { %v279_v57 = vpop.permute.xlu1 %278 }
  0x95   :  { %v357_v61 = vpop.permute.xlu0 %356 }
  0x98   :  { %v362_v63 = vpop.permute.xlu1 %361 }
  0xd9   :  { %v403_v15 = vpop.f32.mrb[0].mxu0 }
  0xda   :  { %v137_v16 = vadd.f32 %v403_v15, %v37_v14  ;;  %v131_v17 = vpop.f32.mrb[1].mxu0 }
  0xdb   :  { %v132_v18 = vadd.f32 %v131_v17, %v32_v12 }
  0xdc   :  { %v151_v19 = vmax.f32 %v137_v16, 0.0 }
  0xdd   :  { %v150_v21 = vmax.f32 %v132_v18, 0.0  ;;  %v406_v22 = vpop.f32.mrb[2].mxu0 }
  0xde   :  { %v147_v23 = vadd.f32 %v406_v22, %v47_v20  ;;  %v141_v24 = vpop.f32.mrb[3].mxu0 }
  0xdf   :  { %v142_v25 = vadd.f32 %v141_v24, %v42_v13  ;;  %v432_v26 = vpack.c.bf16 %v151_v19, %v150_v21 }
  0xe0   :  { %v153_v27 = vmax.f32 %v147_v23, 0.0 }
  0xe1   :  { %v152_v28 = vmax.f32 %v142_v25, 0.0  ;;  %433 = vmatprep.subr.bf16.mxu1 %v432_v26 }
  0xe2   :  { %435 = vmatpush3.bf16.msra.mxu1 %v432_v26 }
  0xe3   :  { %v436_v29 = vpack.c.bf16 %v153_v27, %v152_v28 }
  0xe5   :  { %437 = vmatprep.subr.bf16.mxu1 %v436_v29 }
  0xe6   :  { %439 = vmatpush3.bf16.msra.mxu1 %v436_v29 }
  0xe9   :  { %416 = vmatmul.mubr.msk.f32.vlgmr.msra.gmra.mrb[0].mxu1 %vm174_vm1, %v155_v30 }
  0xea   :  { %418 = vmatprep.mubr.msk.f32.mxu1 %vm174_vm1, %v156_v31 }
  0xed   :  { %419 = vmatmul.mubr.msk.f32.gmra.mrb[2].mxu1 %vm174_vm1, %v157_v32 }
 0x1bc   :  { %v417_v40 = vpop.f32.mrb[0].mxu1 }
 0x1bd   :  { %v259_v41 = vadd.f32 %v417_v40, %v164_v39  ;;  %v253_v42 = vpop.f32.mrb[1].mxu1 }
 0x1be   :  { %v254_v43 = vadd.f32 %v253_v42, %v160_v38 }
 0x1bf   :  { %v273_v44 = vmax.f32 %v259_v41, 0.0 }
 0x1c0   :  { %v272_v46 = vmax.f32 %v254_v43, 0.0  ;;  %v420_v47 = vpop.f32.mrb[2].mxu1 }
 0x1c1   :  { %v269_v49 = vadd.f32 %v420_v47, %v172_v45  ;;  %v263_v50 = vpop.f32.mrb[3].mxu1 }
 0x1c2   :  { %v441_v51 = vpack.c.bf16 %v273_v44, %v272_v46  ;;  %v264_v52 = vadd.f32 %v263_v50, %v168_v48 }
 0x1c3   :  { %v275_v53 = vmax.f32 %v269_v49, 0.0 }
 0x1c4   :  { %v274_v54 = vmax.f32 %v264_v52, 0.0  ;;  %442 = vmatpush3.bf16.msra.mxu0 %v441_v51 }
 0x1c5   :  { %443 = vmatprep.subr.bf16.mxu0 %v466_v33 }
 0x1c6   :  { %v444_v55 = vpack.c.bf16 %v275_v53, %v274_v54 }
 0x1c8   :  { %445 = vmatpush3.bf16.msra.mxu0 %v444_v55 }
 0x1cb   :  { %430 = vmatmul.mubr.msk.f32.vlgmr.msra.gmra.mrb[4].mxu0 %vm174_vm1, %v276_v56 }
 0x29e   :  { %v350_v58 = vpop.f32.mrb[4].mxu0 }
 0x29f   :  { %v351_v59 = vadd.f32 %v350_v58, %v279_v57  ;;  %v431_v60 = vpop.f32.mrb[5].mxu0 }
 0x2a1   :  { %462 = vtanh.f32 %v351_v59 }
 0x2ab   :  { %v463_v62 = vpop.eup %462 }
 0x2ac   :  { %v359_v0 = vmul.f32 %v463_v62, %v357_v61 }
 0x2ae   :  { %v364_v1 = vadd.f32 %v362_v63, %v359_v0 }
 0x2b0   :  { %366 = vst.msk [vmem:[%s570_s5] sm:$0xf] %vm365_vm3, %v364_v1 }

</bundles_post_ra>
